<compile_context>
chip_gen: v7x
topology: tpu7x:2x2x1
jax: 0.10.0
libtpu: 0.0.40
codegen_flags: <defaults>
</compile_context>

<pallas_src>
import jax
import jax.numpy as jnp
from jax import lax
from jax.experimental import pallas as pl
from jax.experimental.pallas import tpu as pltpu


def discriminator_kernel(x_ref, w12_ref, consts_ref, o_ref):
    b12 = consts_ref[0:1, :]      # (1, H) f32  fused bias of Linear1+Linear2
    w3 = consts_ref[1:2, :]       # (1, H) f32  Linear3 weight (row form)
    b3 = consts_ref[2:3, 0:1]     # (1, 1) f32  Linear3 bias

    # Fused Linear1+Linear2: (tile_b, d_in) @ (d_in, H), f32 accumulation (MXU).
    h = jnp.dot(x_ref[...], w12_ref[...],
                preferred_element_type=jnp.float32) + b12
    # LeakyReLU(0.01) in f32 on the VPU.
    h = jnp.where(h >= 0.0, h, 0.01 * h)
    # Linear(H -> 1), produced lane-dense: contract (1, H) with (tile_b, H)
    # over H -> (1, tile_b) directly (no (tile_b, 1) column + relayout).
    h3 = lax.dot_general(w3, h, (((1,), (1,)), ((), ())),
                         preferred_element_type=jnp.float32) + b3
    # Sigmoid: exp on the EUP, divide as approx reciprocal (EUP slot, ~free).
    e = jnp.exp(-h3)
    o_ref[...] = pl.reciprocal(1.0 + e, approx=True).astype(o_ref.dtype)


def fuse_discriminator_params(params, dtype=jnp.float32):
    """Fold Linear1 @ Linear2 (no activation between them in the module) into a
    single (d_in, 64) weight, and pack the small constants into one (3, 64)
    f32 array: row0 = fused bias, row1 = w3, row2 = broadcast b3.
    Call ONCE per weight update (hoist out of inference loops)."""
    w1, b1, w2, b2, w3, b3 = params
    w1f, b1f = w1.astype(jnp.float32), b1.astype(jnp.float32)
    w2f, b2f = w2.astype(jnp.float32), b2.astype(jnp.float32)
    w12 = w1f @ w2f                                    # (d_in, 64)
    b12 = b1f @ w2f + b2f                              # (1, 64)
    n_hidden = w12.shape[1]
    consts = jnp.concatenate(
        [b12,
         w3.reshape(1, n_hidden).astype(jnp.float32),
         jnp.broadcast_to(b3.reshape(1, 1).astype(jnp.float32), (1, n_hidden))],
        axis=0)                                        # (3, 64) f32
    return w12.astype(dtype), consts


def _choose_tile_b(B, d_in, itemsize, requested):
    """Batch tile: multiple of 128 (lane-dense out), large DMAs, double-buffered
    x within a modest VMEM budget, and >= 2 grid steps for v7x dual-TC."""
    if B <= 128:
        return B                       # single block == full array dims
    tb = max(128, min(int(requested), 2048))
    tb = (tb // 128) * 128
    vmem_cap = 16 * 1024 * 1024        # budget for the double-buffered x tiles
    while tb > 128 and 2 * tb * d_in * itemsize > vmem_cap:
        tb -= 128
    while tb > 128 and pl.cdiv(B, tb) < 2:
        tb = max(128, ((tb // 2) // 128) * 128)
    return tb


def discriminator_apply(x, w12, consts, *, tile_b=1024):
    """x: (B, d_in), any float dtype (bf16 x halves the dominant HBM stream).
    w12: (d_in, H) fused weight, consts: (3, H) f32. Returns (B, 1) f32."""
    B, d_in = x.shape
    n_hidden = w12.shape[1]
    if w12.dtype != x.dtype:
        w12 = w12.astype(x.dtype)      # tiny (d_in, H) cast; x is never recast
    itemsize = jnp.dtype(x.dtype).itemsize

    tb = _choose_tile_b(B, d_in, itemsize, tile_b)
    grid = (pl.cdiv(B, tb),)           # no jnp.pad: partial last block is masked

    out = pl.pallas_call(
        discriminator_kernel,
        out_shape=jax.ShapeDtypeStruct((1, B), jnp.float32),   # lane-dense
        grid=grid,
        in_specs=[
            pl.BlockSpec((tb, d_in), lambda i: (i, 0)),        # streamed x tiles
            pl.BlockSpec((d_in, n_hidden), lambda i: (0, 0)),  # resident W12
            pl.BlockSpec((3, n_hidden), lambda i: (0, 0)),     # resident consts
        ],
        out_specs=pl.BlockSpec((1, tb), lambda i: (0, i)),
        compiler_params=pltpu.CompilerParams(
            dimension_semantics=("parallel",),   # shard tiles on v7x's 2 TCs
            # Tiny footprint at these shapes; 32 MiB is safe on v5e/v6e/v7x
            # (cap ~48 MiB on v7x if tiles are ever scaled up).
            vmem_limit_bytes=32 * 1024 * 1024,
        ),
    )(x, w12, consts)

    # (1, B) -> (B, 1): trivial reshape, no relayout pass over HBM.
    return out.reshape(B, 1)


def discriminator_forward(x, params, *, tile_b=1024):
    """Convenience wrapper (fuses every call). For inference loops, hoist
    fuse_discriminator_params out and call discriminator_apply directly."""
    w12, consts = fuse_discriminator_params(params, dtype=x.dtype)
    return discriminator_apply(x, w12, consts, tile_b=tile_b)


def init_params(key, im_dim):
    """Deterministic init mimicking PyTorch nn.Linear default U[-1/sqrt(fan_in), +]."""
    d_in = im_dim * im_dim
    dims = [(d_in, 128), (128, 64), (64, 1)]
    params = []
    for fan_in, fan_out in dims:
        key, kw, kb = jax.random.split(key, 3)
        bound = 1.0 / jnp.sqrt(fan_in)
        w = jax.random.uniform(kw, (fan_in, fan_out), jnp.float32, -bound, bound)
        b = jax.random.uniform(kb, (1, fan_out), jnp.float32, -bound, bound)
        params += [w, b]
    return tuple(params)


def reference_forward(x, params):
    """Un-fused f32 reference matching the PyTorch module exactly."""
    w1, b1, w2, b2, w3, b3 = params
    h = x @ w1 + b1
    h = h @ w2 + b2
    h = jnp.where(h >= 0.0, h, 0.01 * h)
    h = h @ w3 + b3
    return jax.nn.sigmoid(h)


if __name__ == "__main__":
    im_dim = 16                        # flattened input dim = 256
    key = jax.random.PRNGKey(0)
    key, kp = jax.random.split(key)
    params = init_params(kp, im_dim)

    # Hoisted fusion (done once, reused across calls).
    w12_f32, consts = fuse_discriminator_params(params, dtype=jnp.float32)

    # 1) Small single-block batch, f32.
    key, kx = jax.random.split(key)
    x = jax.random.normal(kx, (8, im_dim * im_dim), jnp.float32)
    out = jax.block_until_ready(discriminator_apply(x, w12_f32, consts))
    ref = reference_forward(x, params)
    assert out.shape == (8, 1)
    assert jnp.allclose(out, ref, atol=1e-2, rtol=1e-2), \
        float(jnp.max(jnp.abs(out - ref)))

    # 2) Multi-step grid with a partial (masked) last block, f32, no padding.
    key, kx2 = jax.random.split(key)
    x2 = jax.random.normal(kx2, (300, im_dim * im_dim), jnp.float32)
    out2 = jax.block_until_ready(discriminator_apply(x2, w12_f32, consts))
    ref2 = reference_forward(x2, params)
    assert out2.shape == (300, 1)
    assert jnp.allclose(out2, ref2, atol=1e-2, rtol=1e-2), \
        float(jnp.max(jnp.abs(out2 - ref2)))

    # 3) bf16 streaming path: producer hands in bf16 x (no wrapper cast of x).
    w12_bf16, _ = fuse_discriminator_params(params, dtype=jnp.bfloat16)
    x2_bf16 = x2.astype(jnp.bfloat16)
    out3 = jax.block_until_ready(discriminator_apply(x2_bf16, w12_bf16, consts))
    assert out3.shape == (300, 1)
    assert jnp.allclose(out3, ref2, atol=3e-2, rtol=3e-2), \
        float(jnp.max(jnp.abs(out3 - ref2)))

    print("KERNEL_OK")
</pallas_src>

<mosaic_0001>
module attributes {stable_mosaic.version = 11 : i64} {
  func.func @discriminator_kernel(%arg0: i32, %arg1: memref<8x256xf32, #tpu.memory_space<vmem>>, %arg2: memref<256x64xf32, #tpu.memory_space<vmem>>, %arg3: memref<3x64xf32, #tpu.memory_space<vmem>>, %arg4: memref<1x8xf32, #tpu.memory_space<vmem>>) attributes {dimension_semantics = [#tpu.dimension_semantics<parallel>], iteration_bounds = array<i64: 1>, scalar_prefetch = 0 : i64, scratch_operands = 0 : i64, tpu.core_type = #tpu.core_type<tc>, window_params = [{transform_indices = @transform_0, window_bounds = array<i64: 8, 256>}, {pipeline_mode = #tpu.pipeline_mode<synchronous>, transform_indices = @transform_1, window_bounds = array<i64: 256, 64>}, {pipeline_mode = #tpu.pipeline_mode<synchronous>, transform_indices = @transform_2, window_bounds = array<i64: 3, 64>}, {transform_indices = @transform_3, window_bounds = array<i64: 1, 8>}]} {
    %c0 = arith.constant 0 : index
    %c0_0 = arith.constant 0 : index
    %0 = vector.load %arg3[%c0, %c0_0] : memref<3x64xf32, #tpu.memory_space<vmem>>, vector<1x64xf32>
    %c1 = arith.constant 1 : index
    %c0_1 = arith.constant 0 : index
    %1 = vector.load %arg3[%c1, %c0_1] : memref<3x64xf32, #tpu.memory_space<vmem>>, vector<1x64xf32>
    %c2 = arith.constant 2 : index
    %c0_2 = arith.constant 0 : index
    %2 = vector.load %arg3[%c2, %c0_2] : memref<3x64xf32, #tpu.memory_space<vmem>>, vector<1x1xf32>
    %c0_3 = arith.constant 0 : index
    %c0_4 = arith.constant 0 : index
    %3 = vector.load %arg1[%c0_3, %c0_4] : memref<8x256xf32, #tpu.memory_space<vmem>>, vector<8x256xf32>
    %c0_5 = arith.constant 0 : index
    %c0_6 = arith.constant 0 : index
    %4 = vector.load %arg2[%c0_5, %c0_6] : memref<256x64xf32, #tpu.memory_space<vmem>>, vector<256x64xf32>
    %cst = arith.constant dense<0.000000e+00> : vector<8x64xf32>
    %5 = tpu.matmul %3, %4, %cst {dimension_numbers = #tpu.dot_dimension_numbers<[1], [0], [0], [1], [0, 0, 1, 1], [], []>} : vector<8x256xf32>, vector<256x64xf32>, vector<8x64xf32> -> vector<8x64xf32>
    %6 = vector.broadcast %0 : vector<1x64xf32> to vector<8x64xf32>
    %7 = arith.addf %5, %6 : vector<8x64xf32>
    %cst_7 = arith.constant 0.000000e+00 : f32
    %8 = vector.broadcast %cst_7 : f32 to vector<8x64xf32>
    %9 = arith.cmpf oge, %7, %8 : vector<8x64xf32>
    %cst_8 = arith.constant 0.00999999977 : f32
    %10 = vector.broadcast %cst_8 : f32 to vector<8x64xf32>
    %11 = arith.mulf %10, %7 : vector<8x64xf32>
    %12 = arith.select %9, %7, %11 : vector<8x64xi1>, vector<8x64xf32>
    %cst_9 = arith.constant dense<0.000000e+00> : vector<1x8xf32>
    %13 = tpu.matmul %1, %12, %cst_9 {dimension_numbers = #tpu.dot_dimension_numbers<[1], [1], [0], [0], [0, 0, 1, 0], [], []>} : vector<1x64xf32>, vector<8x64xf32>, vector<1x8xf32> -> vector<1x8xf32>
    %14 = vector.broadcast %2 : vector<1x1xf32> to vector<1x8xf32>
    %15 = arith.addf %13, %14 : vector<1x8xf32>
    %cst_10 = arith.constant 0.000000e+00 : f32
    %16 = vector.broadcast %cst_10 : f32 to vector<1x8xf32>
    %17 = arith.subf %16, %15 : vector<1x8xf32>
    %18 = math.exp %17 : vector<1x8xf32>
    %cst_11 = arith.constant 1.000000e+00 : f32
    %19 = vector.broadcast %cst_11 : f32 to vector<1x8xf32>
    %20 = arith.addf %19, %18 : vector<1x8xf32>
    %21 = tpu.reciprocal %20 {approx = true} : vector<1x8xf32> -> vector<1x8xf32>
    %c0_12 = arith.constant 0 : index
    %c0_13 = arith.constant 0 : index
    %22 = vector.load %arg4[%c0_12, %c0_13] : memref<1x8xf32, #tpu.memory_space<vmem>>, vector<1x8xf32>
    tpu.vector_store %arg4[%c0_12, %c0_13], %21 {strides = array<i32>} : memref<1x8xf32, #tpu.memory_space<vmem>>, vector<1x8xf32>,
    return
  }
  func.func @transform_0(%arg0: i32) -> (i32, i32) {
    %c0_i32 = arith.constant 0 : i32
    %c0_i32_0 = arith.constant 0 : i32
    return %arg0, %c0_i32 : i32, i32
  }
  func.func @transform_1(%arg0: i32) -> (i32, i32) {
    %c0_i32 = arith.constant 0 : i32
    %c0_i32_0 = arith.constant 0 : i32
    %c0_i32_1 = arith.constant 0 : i32
    return %c0_i32, %c0_i32_0 : i32, i32
  }
  func.func @transform_2(%arg0: i32) -> (i32, i32) {
    %c0_i32 = arith.constant 0 : i32
    %c0_i32_0 = arith.constant 0 : i32
    %c0_i32_1 = arith.constant 0 : i32
    return %c0_i32, %c0_i32_0 : i32, i32
  }
  func.func @transform_3(%arg0: i32) -> (i32, i32) {
    %c0_i32 = arith.constant 0 : i32
    %c0_i32_0 = arith.constant 0 : i32
    return %c0_i32, %arg0 : i32, i32
  }
}

</mosaic_0001>

<bundles_post_ra>
// kernel: tpu_custom_call.1
= control target key start
LH: loop header
LB: loop body
LE: loop exit
PB: predicated region body
PF: predicated region fallthrough
CT: control target
= control target key end

     0   :  { %s489_s0 = inlined_call_operand.vmem [shape: f32[8,256], index: 0, kind: input, shape index: {}]   ;;  %s490_s1 = inlined_call_operand.vmem [shape: f32[256,64], index: 1, kind: input, shape index: {}]   ;;  %s491_s2 = inlined_call_operand.vmem [shape: f32[3,64], index: 2, kind: input, shape index: {}]   ;;  %s492_s3 = inlined_call_operand.hbm [shape: f32[1,8], index: 3, kind: output, shape index: {}]  }
   0x1   :  { %v36_v0 = vld [vmem:[%s490_s1 + $0x80] sm:$0xff]  ;;  %v37_v1 = vld [vmem:[%s490_s1 + $0x88] sm:$0xff]  ;;  %v38_v5 = vld [vmem:[%s490_s1 + $0x90] sm:$0xff] }
   0x2   :  { %v20_v2 = vld [vmem:[%s490_s1] sm:$0xff]  ;;  %v277_v3 = vpack.c.bf16 %v37_v1, %v36_v0  ;;  %v21_v4 = vld [vmem:[%s490_s1 + $0x8] sm:$0xff]  ;;  %v39_v6 = vld [vmem:[%s490_s1 + $0x98] sm:$0xff] }
   0x3   :  { %v279_v7 = vpack.c.bf16 %v21_v4, %v20_v2  ;;  %v281_v8 = vpack.c.bf16 %v39_v6, %v38_v5  ;;  %v22_v9 = vld [vmem:[%s490_s1 + $0x10] sm:$0xff]  ;;  %v23_v10 = vld [vmem:[%s490_s1 + $0x18] sm:$0xff]  ;;  %v40_v11 = vld [vmem:[%s490_s1 + $0xa0] sm:$0xff] }
   0x4   :  { %278 = vmatprep.subr.bf16.mxu0 %v277_v3  ;;  %v41_v12 = vld [vmem:[%s490_s1 + $0xa8] sm:$0xff]  ;;  %v283_v13 = vpack.c.bf16 %v23_v10, %v22_v9  ;;  %v24_v15 = vld [vmem:[%s490_s1 + $0x20] sm:$0xff]  ;;  %v42_v17 = vld [vmem:[%s490_s1 + $0xb0] sm:$0xff] }
   0x5   :  { %280 = vmatpush3.bf16.msra.mxu0 %v279_v7  ;;  %v285_v14 = vpack.c.bf16 %v41_v12, %v40_v11  ;;  %v25_v16 = vld [vmem:[%s490_s1 + $0x28] sm:$0xff]  ;;  %v43_v18 = vld [vmem:[%s490_s1 + $0xb8] sm:$0xff]  ;;  %v26_v21 = vld [vmem:[%s490_s1 + $0x30] sm:$0xff] }
   0x6   :  { %282 = vmatprep.subr.bf16.mxu0 %v281_v8  ;;  %v287_v19 = vpack.c.bf16 %v25_v16, %v24_v15  ;;  %v289_v20 = vpack.c.bf16 %v43_v18, %v42_v17  ;;  %v27_v22 = vld [vmem:[%s490_s1 + $0x38] sm:$0xff]  ;;  %v44_v23 = vld [vmem:[%s490_s1 + $0xc0] sm:$0xff]  ;;  %v45_v24 = vld [vmem:[%s490_s1 + $0xc8] sm:$0xff] }
   0x7   :  { %v19_v25 = vld [vmem:[%s489_s0 + $0x8] sm:$0xff] }
   0x8   :  { %120 = vmatprep.mubr.f32.mxu0 %v19_v25 }
   0x9   :  { %284 = vmatpush3.bf16.msra.mxu0 %v283_v13 }
   0xa   :  { %286 = vmatprep.subr.bf16.mxu0 %v285_v14 }
   0xb   :  { %8 = vsyncpa [#allocation3], 0  ;;  %v291_v26 = vpack.c.bf16 %v27_v22, %v26_v21  ;;  %v293_v27 = vpack.c.bf16 %v45_v24, %v44_v23  ;;  %v28_v28 = vld [vmem:[%s490_s1 + $0x40] sm:$0xff]  ;;  %v29_v29 = vld [vmem:[%s490_s1 + $0x48] sm:$0xff]  ;;  %v342_v50 = vmov 0.0   ;;  %vm343_vm0 = vmmov 0  }
   0xc   :  { %v46_v30 = vld [vmem:[%s490_s1 + $0xd0] sm:$0xff]  ;;  %v47_v31 = vld [vmem:[%s490_s1 + $0xd8] sm:$0xff]  ;;  %v295_v32 = vpack.c.bf16 %v29_v29, %v28_v28  ;;  %v48_v36 = vld [vmem:[%s490_s1 + $0xe0] sm:$0xff]  ;;  %272 = vmatprep.subr.mxu1 %v342_v50  ;;  %274 = vmatprep.mubr.msk.f32.mxu1 %vm343_vm0, %v342_v50  ;;  %v344_v52 = vmov 0   ;;  %vm134_vm2 = vcmask 523264   ;;  %s345_s30 = smov [#allocation2]  }
   0xd   :  { %288 = vmatpush3.bf16.msra.mxu0 %v287_v19  ;;  %v297_v33 = vpack.c.bf16 %v47_v31, %v46_v30  ;;  %v30_v34 = vld [vmem:[%s490_s1 + $0x50] sm:$0xff]  ;;  %v31_v35 = vld [vmem:[%s490_s1 + $0x58] sm:$0xff]  ;;  %v49_v37 = vld [vmem:[%s490_s1 + $0xe8] sm:$0xff]  ;;  %313 = vset.pattern.permute.xlu0 %v344_v52  ;;  %s224_s4 = sshll.u32 %s345_s30, 4  ;;  %vm216_vm3 = vcmask 57344   ;;  %s225_s4 = int_to_ptr.vmem [resolvable:$true] %s224_s4 }
   0xe   :  { %290 = vmatprep.subr.bf16.mxu0 %v289_v20  ;;  %v299_v38 = vpack.c.bf16 %v31_v35, %v30_v34  ;;  %v301_v39 = vpack.c.bf16 %v49_v37, %v48_v36  ;;  %v32_v40 = vld [vmem:[%s490_s1 + $0x60] sm:$0xff]  ;;  %v33_v41 = vld [vmem:[%s490_s1 + $0x68] sm:$0xff]  ;;  %v50_v42 = vld [vmem:[%s490_s1 + $0xf0] sm:$0xff]  ;;  %s318_s5 = scalar_lea.vmem %s225_s4, 16  ;;  %p323_p1 = scmp.lt.s32.totalorder %s225_s4, %s225_s4 }
   0xf   :  { %v51_v43 = vld [vmem:[%s490_s1 + $0xf8] sm:$0xff]  ;;  %v303_v44 = vpack.c.bf16 %v33_v41, %v32_v40  ;;  %v34_v46 = vld [vmem:[%s490_s1 + $0x70] sm:$0xff]  ;;  %v18_v49 = vld [vmem:[%s489_s0] sm:$0xff]  ;;  %p319_p0 = scmp.ne.s32.totalorder %s225_s4, %s318_s5 }
  0x10   :  { %v305_v45 = vpack.c.bf16 %v51_v43, %v50_v42  ;;  %v35_v47 = vld [vmem:[%s490_s1 + $0x78] sm:$0xff]  ;;  %v17_v51 = vld [vmem:[%s491_s2 + $0x2] sm:$0x1]  ;;  %v232_v54 = vld [vmem:[%s491_s2] ss:$0 sm:$0xff] }
  0x11   :  { %292 = vmatpush3.bf16.msra.mxu0 %v291_v26  ;;  %v307_v48 = vpack.c.bf16 %v35_v47, %v34_v46  ;;  %131 = vperm.xlu0 %313, %v17_v51   ;;  %v16_v60 = vld [vmem:[%s491_s2 + $0x1] sm:$0x1]  ;;  %s322_s2 = scalar_lea.vmem %s225_s4, 32 }
  0x12   :  { %294 = vmatprep.subr.bf16.mxu0 %v293_v27  ;;  %p324_p2 = scmp.lt.s32.totalorder %s322_s2, %s318_s5 }
  0x14   :  { %p325_p3 = por %p324_p2, %p323_p1 }
  0x15   :  { %296 = vmatpush3.bf16.msra.mxu0 %v295_v32 }
  0x16   :  { %298 = vmatprep.subr.bf16.mxu0 %v297_v33  ;;  %p326_p4 = pnand %p325_p3, %p319_p0 }
  0x19   :  { %300 = vmatpush3.bf16.msra.mxu0 %v299_v38 }
  0x1a   :  { %302 = vmatprep.subr.bf16.mxu0 %v301_v39 }
  0x1d   :  { %304 = vmatpush3.bf16.msra.mxu0 %v303_v44 }
  0x1e   :  { %306 = vmatprep.subr.bf16.mxu0 %v305_v45 }
  0x21   :  { %308 = vmatpush3.bf16.msra.mxu0 %v307_v48 }
  0x24   :  { %121 = vmatmul.mubr.f32.vlgmr.msra.gmra.mrb[0].mxu0 %v18_v49 }
  0x90   :  { %v132_v61 = vpop.permute.xlu0 %131 }
  0xf7   :  { %v267_v53 = vpop.f32.mrb[0].mxu0 }
  0xf8   :  { %v268_v55 = vpop.f32.mrb[1].mxu0 }
  0xf9   :  { %v269_v56 = vadd.f32 %v268_v55, %v267_v53 }
  0xfb   :  { %v123_v57 = vadd.f32 %v269_v56, %v232_v54 }
  0xfd   :  { %vm126_vm1 = vcmp.ge.f32.partialorder %v123_v57, 0.0  ;;  %v127_v58 = vmul.f32 0.01, %v123_v57 }
  0xff   :  { %v128_v59 = vsel %vm126_vm1, %v123_v57, %v127_v58 }
 0x100   :  { %273 = vmatpush3.xpose.msk.msra.mxu1 %vm134_vm2, %v128_v59 }
 0x103   :  { %275 = vmatmul.mubr.msk.f32.vlgmr.msra.gmra.mrb[0].mxu1 %vm134_vm2, %v16_v60 }
 0x1d6   :  { %v207_v62 = vpop.f32.mrb[0].mxu1 }
 0x1d7   :  { %v208_v63 = vadd.f32 %v207_v62, %v132_v61  ;;  %v276_v0 = vpop.f32.mrb[1].mxu1 }
 0x1d9   :  { %v211_v1 = vsub.f32 0.0, %v208_v63 }
 0x1db   :  { %v212_v2 = vmul.f32 1.442695, %v211_v1 }
 0x1dd   :  { %314 = vpow2.f32 %v212_v2 }
 0x1e7   :  { %v315_v3 = vpop.eup %314 }
 0x1e8   :  { %v214_v4 = vadd.f32 1.0, %v315_v3 }
 0x1ea   :  { %316 = vrcp.f32 %v214_v4 }
 0x1f4   :  { %v317_v5 = vpop.eup %316 }
 0x1f5   :  { %217 = vst.msk [vmem:[#allocation2] sm:$0x1] %vm216_vm3, %v317_v5 }
 0x1f6   :  { %329 = shalt.err (!%p326_p4)
}
 0x1f7   :  { %s330_s8 = scalar_lea.hbm %s492_s3, 16 }
 0x1f8   :  { %p331_p5 = scmp.ne.s32.totalorder %s492_s3, %s330_s8  ;;  %p334_p6 = scmp.lt.u32.totalorder %s330_s8, %s492_s3 }
 0x1fa   :  { %p336_p7 = pnand %p334_p6, %p331_p5 }
 0x1fc   :  { %339 = shalt.err (!%p336_p7)
}
 0x1fd   :  { %227 = dma.vmem_to_hbm [thread:$0]  %s225_s4, 16, %s492_s3, [#allocation3]  }
 0x1fe   :  { %340 = dma.done.wait [#allocation3], 16  }
 0x1ff   :  { %341 = vsyncadd [#allocation3], 4294967280 }
 0x200   :  { %231 = vsyncpa [#allocation3], 1 }

</bundles_post_ra>
